<compile_context>
chip_gen: v5e
topology: v5e:2x2
jax: 0.10.0
libtpu: 0.0.40
codegen_flags: <defaults>
</compile_context>

<pallas_src>
import jax
import jax.numpy as jnp
from jax.experimental import pallas as pl
from jax.experimental.pallas import tpu as pltpu

IN_FEATURES = 84
OUT_FEATURES = 10

_LANES = 128
_SUBLANES = 8
_SMALL_BATCH_FASTPATH = 512   # below this, XLA's fused matmul beats a standalone pallas_call
_SPLIT_FOR_TWO_CORES = 2048   # above this, force >=2 grid steps so v7x can use both TCs


def _linear_kernel(x_ref, w_ref, b_ref, o_ref):
    # Hot path: MXU matmul (f32 accumulate) + bias add for one batch tile.
    x = x_ref[...]                      # (TB, 84)
    w = w_ref[...]                      # (84, 10)  — VMEM-resident across grid steps
    b = b_ref[...]                      # (1, 10)   — VMEM-resident across grid steps
    acc = jnp.dot(x, w, preferred_element_type=jnp.float32)
    o_ref[...] = (acc + b).astype(o_ref.dtype)


def prepare_params(weight, bias):
    """One-time parameter prep (hoisted out of the per-call path).

    weight: (10, 84) PyTorch nn.Linear layout; bias: (10,).
    Returns (w_t, b2) with w_t: (84, 10), b2: (1, 10).
    """
    assert weight.shape == (OUT_FEATURES, IN_FEATURES), weight.shape
    assert bias.shape == (OUT_FEATURES,), bias.shape
    return weight.T, bias.reshape(1, OUT_FEATURES)


def _round_up(n, m):
    return ((n + m - 1) // m) * m


def _choose_tile(B, tb):
    """Pick the batch-tile size for the Pallas path."""
    if B <= tb:
        if B > _SPLIT_FOR_TWO_CORES:
            # Large batch that still fits one tile: split into >=2 grid steps so the
            # "parallel" batch axis gives v7x's second TensorCore work. Keep the tile
            # a multiple of 8 (sublane constraint for non-full blocks).
            return min(tb, _round_up(pl.cdiv(B, 2), _SUBLANES))
        # Single block; block dims equal full array dims, so any B (incl. B=2) is legal.
        return B
    assert tb % _SUBLANES == 0, "batch tile must be a multiple of 8"
    return tb


def _vmem_limit_bytes(tb_eff, x_itemsize, out_itemsize):
    # Double-buffered x and out blocks; last dims (84 / 10) pad to 128 lanes in VMEM.
    per_row = _LANES
    footprint = 2 * tb_eff * per_row * x_itemsize + 2 * tb_eff * per_row * out_itemsize
    # Add headroom for weight/bias/compiler scratch; clamp to a range that is legal on
    # every generation (v7x physical VMEM is 64 MiB per TensorCore).
    return int(min(max(footprint + (8 << 20), 32 << 20), 48 << 20))


def output_model_cifar_forward(x, w_t, b2, *, tb=4096, force_pallas=False):
    """x: (B, 84) f32/bf16; w_t: (84, 10) pre-transposed; b2: (1, 10). Returns (B, 10)."""
    assert x.ndim == 2 and x.shape[1] == IN_FEATURES, x.shape
    assert w_t.shape == (IN_FEATURES, OUT_FEATURES), w_t.shape
    assert b2.shape == (1, OUT_FEATURES), b2.shape

    B = x.shape[0]

    if not force_pallas and B < _SMALL_BATCH_FASTPATH:
        # Small-batch fast path: custom-call launch + single-step pipeline overhead
        # dominate; XLA's fused tiny matmul is strictly cheaper here.
        y = jnp.dot(x, w_t, preferred_element_type=jnp.float32) + b2
        return y.astype(x.dtype)

    tb_eff = _choose_tile(B, tb)
    grid = (pl.cdiv(B, tb_eff),)

    cost = pl.CostEstimate(
        flops=2 * B * IN_FEATURES * OUT_FEATURES,
        bytes_accessed=(B * (IN_FEATURES + OUT_FEATURES) * x.dtype.itemsize
                        + IN_FEATURES * OUT_FEATURES * w_t.dtype.itemsize
                        + OUT_FEATURES * b2.dtype.itemsize),
        transcendentals=0,
    )

    return pl.pallas_call(
        _linear_kernel,
        out_shape=jax.ShapeDtypeStruct((B, OUT_FEATURES), x.dtype),
        grid=grid,
        in_specs=[
            pl.BlockSpec((tb_eff, IN_FEATURES), lambda i: (i, 0)),
            pl.BlockSpec((IN_FEATURES, OUT_FEATURES), lambda i: (0, 0)),
            pl.BlockSpec((1, OUT_FEATURES), lambda i: (0, 0)),
        ],
        out_specs=pl.BlockSpec((tb_eff, OUT_FEATURES), lambda i: (i, 0)),
        compiler_params=pltpu.CompilerParams(
            # Batch steps are independent -> let v7x shard them across its 2 TCs.
            dimension_semantics=("parallel",),
            vmem_limit_bytes=_vmem_limit_bytes(tb_eff, x.dtype.itemsize, x.dtype.itemsize),
        ),
        cost_estimate=cost,
    )(x, w_t, b2)


def _reference_forward(x, weight, bias):
    # Pure-JAX reference matching torch.nn.Linear semantics: x @ W^T + b
    return x @ weight.T + bias


if __name__ == "__main__":
    key = jax.random.PRNGKey(0)
    k_x, k_w, k_b, k_x2, k_x3 = jax.random.split(key, 5)

    # Deterministic synthetic parameters (nn.Linear(84, 10) shapes, PyTorch layout).
    weight = jax.random.normal(k_w, (OUT_FEATURES, IN_FEATURES), dtype=jnp.float32) * 0.1
    bias = jax.random.normal(k_b, (OUT_FEATURES,), dtype=jnp.float32) * 0.1
    w_t, b2 = prepare_params(weight, bias)   # hoisted, done once

    # 1) Small batch, forced Pallas path (single block == full array dims, B=2).
    batch = 2
    x = jax.random.normal(k_x, (batch, IN_FEATURES), dtype=jnp.float32)
    out = jax.block_until_ready(output_model_cifar_forward(x, w_t, b2, force_pallas=True))
    ref = _reference_forward(x, weight, bias)
    assert out.shape == (batch, OUT_FEATURES)
    assert jnp.allclose(out, ref, atol=1e-5, rtol=1e-5)

    # 2) Small batch, default auto path (XLA fused fast path).
    out_fast = jax.block_until_ready(output_model_cifar_forward(x, w_t, b2))
    assert out_fast.shape == (batch, OUT_FEATURES)
    assert jnp.allclose(out_fast, ref, atol=1e-5, rtol=1e-5)

    # 3) Multi-step batch-tiled Pallas path (exercises the pipelined grid, tiny tile).
    batch2 = 24
    x2 = jax.random.normal(k_x2, (batch2, IN_FEATURES), dtype=jnp.float32)
    out2 = jax.block_until_ready(
        output_model_cifar_forward(x2, w_t, b2, tb=8, force_pallas=True))
    ref2 = _reference_forward(x2, weight, bias)
    assert out2.shape == (batch2, OUT_FEATURES)
    assert jnp.allclose(out2, ref2, atol=1e-5, rtol=1e-5)

    # 4) Multi-step path with a partial final tile (272 rows, tile 128 -> 3 steps).
    batch3 = 272
    x3 = jax.random.normal(k_x3, (batch3, IN_FEATURES), dtype=jnp.float32)
    out3 = jax.block_until_ready(
        output_model_cifar_forward(x3, w_t, b2, tb=128, force_pallas=True))
    ref3 = _reference_forward(x3, weight, bias)
    assert out3.shape == (batch3, OUT_FEATURES)
    assert jnp.allclose(out3, ref3, atol=1e-5, rtol=1e-5)

    print("KERNEL_OK")
</pallas_src>

<mosaic_0001>
module attributes {stable_mosaic.version = 11 : i64} {
  func.func @_linear_kernel(%arg0: i32, %arg1: memref<2x84xf32, #tpu.memory_space<vmem>>, %arg2: memref<84x10xf32, #tpu.memory_space<vmem>>, %arg3: memref<1x10xf32, #tpu.memory_space<vmem>>, %arg4: memref<2x10xf32, #tpu.memory_space<vmem>>) attributes {dimension_semantics = [#tpu.dimension_semantics<parallel>], iteration_bounds = array<i64: 1>, scalar_prefetch = 0 : i64, scratch_operands = 0 : i64, tpu.core_type = #tpu.core_type<tc>, window_params = [{transform_indices = @transform_0, window_bounds = array<i64: 2, 84>}, {pipeline_mode = #tpu.pipeline_mode<synchronous>, transform_indices = @transform_1, window_bounds = array<i64: 84, 10>}, {pipeline_mode = #tpu.pipeline_mode<synchronous>, transform_indices = @transform_2, window_bounds = array<i64: 1, 10>}, {transform_indices = @transform_3, window_bounds = array<i64: 2, 10>}]} {
    %c0 = arith.constant 0 : index
    %c0_0 = arith.constant 0 : index
    %0 = vector.load %arg1[%c0, %c0_0] : memref<2x84xf32, #tpu.memory_space<vmem>>, vector<2x84xf32>
    %c0_1 = arith.constant 0 : index
    %c0_2 = arith.constant 0 : index
    %1 = vector.load %arg2[%c0_1, %c0_2] : memref<84x10xf32, #tpu.memory_space<vmem>>, vector<84x10xf32>
    %c0_3 = arith.constant 0 : index
    %c0_4 = arith.constant 0 : index
    %2 = vector.load %arg3[%c0_3, %c0_4] : memref<1x10xf32, #tpu.memory_space<vmem>>, vector<1x10xf32>
    %cst = arith.constant dense<0.000000e+00> : vector<2x10xf32>
    %3 = tpu.matmul %0, %1, %cst {dimension_numbers = #tpu.dot_dimension_numbers<[1], [0], [0], [1], [0, 0, 1, 1], [], []>} : vector<2x84xf32>, vector<84x10xf32>, vector<2x10xf32> -> vector<2x10xf32>
    %4 = vector.broadcast %2 : vector<1x10xf32> to vector<2x10xf32>
    %5 = arith.addf %3, %4 : vector<2x10xf32>
    %c0_5 = arith.constant 0 : index
    %c0_6 = arith.constant 0 : index
    %6 = vector.load %arg4[%c0_5, %c0_6] : memref<2x10xf32, #tpu.memory_space<vmem>>, vector<2x10xf32>
    tpu.vector_store %arg4[%c0_5, %c0_6], %5 {strides = array<i32>} : memref<2x10xf32, #tpu.memory_space<vmem>>, vector<2x10xf32>,
    return
  }
  func.func @transform_0(%arg0: i32) -> (i32, i32) {
    %c0_i32 = arith.constant 0 : i32
    %c0_i32_0 = arith.constant 0 : i32
    return %arg0, %c0_i32 : i32, i32
  }
  func.func @transform_1(%arg0: i32) -> (i32, i32) {
    %c0_i32 = arith.constant 0 : i32
    %c0_i32_0 = arith.constant 0 : i32
    %c0_i32_1 = arith.constant 0 : i32
    return %c0_i32, %c0_i32_0 : i32, i32
  }
  func.func @transform_2(%arg0: i32) -> (i32, i32) {
    %c0_i32 = arith.constant 0 : i32
    %c0_i32_0 = arith.constant 0 : i32
    %c0_i32_1 = arith.constant 0 : i32
    return %c0_i32, %c0_i32_0 : i32, i32
  }
  func.func @transform_3(%arg0: i32) -> (i32, i32) {
    %c0_i32 = arith.constant 0 : i32
    %c0_i32_0 = arith.constant 0 : i32
    return %arg0, %c0_i32 : i32, i32
  }
}

</mosaic_0001>

<bundles_post_ra>
// kernel: tpu_custom_call.1
= control target key start
LH: loop header
LB: loop body
LE: loop exit
PB: predicated region body
PF: predicated region fallthrough
CT: control target
= control target key end

     0   :  { %vm35_vm0 = vcmask 1043456   ;;  %s170_s0 = inlined_call_operand.vmem [shape: f32[2,84], index: 0, kind: input, shape index: {}]   ;;  %s171_s1 = inlined_call_operand.vmem [shape: f32[84,10], index: 1, kind: input, shape index: {}]   ;;  %s172_s2 = inlined_call_operand.vmem [shape: f32[1,10], index: 2, kind: input, shape index: {}]   ;;  %s173_s3 = inlined_call_operand.hbm [shape: f32[2,10], index: 3, kind: output, shape index: {}]  }
   0x1   :  { %v26_v0 = vld [vmem:[%s171_s1 + $0x50] sm:$0xf]  ;;  %v25_v1 = vld [vmem:[%s171_s1 + $0x48] sm:$0xff]  ;;  %v24_v2 = vld [vmem:[%s171_s1 + $0x40] sm:$0xff] }
   0x2   :  { %77 = vmatpush.msk.msra.mxu0 %vm35_vm0, %v26_v0  ;;  %v23_v3 = vld [vmem:[%s171_s1 + $0x38] sm:$0xff] }
   0x4   :  { %45 = vmatpush.msra.mxu0 %v25_v1 }
   0x5   :  { %8 = vsyncpa [#allocation3], 0  ;;  %v22_v4 = vld [vmem:[%s171_s1 + $0x30] sm:$0xff]  ;;  %v21_v5 = vld [vmem:[%s171_s1 + $0x28] sm:$0xff]  ;;  %vm31_vm1 = vcmask 687104   ;;  %s107_s11 = smov [#allocation2]  }
   0x6   :  { %46 = vmatpush.msra.mxu0 %v24_v2  ;;  %v20_v6 = vld [vmem:[%s171_s1 + $0x20] sm:$0xff]  ;;  %v19_v7 = vld [vmem:[%s171_s1 + $0x18] sm:$0xff]  ;;  %v18_v8 = vld [vmem:[%s171_s1 + $0x10] sm:$0xff]  ;;  %s66_s12 = sshll.u32 %s107_s11, 4  ;;  %s68_s15 = sshll.u32 %s173_s3, 4  ;;  %vm59_vm2 = vcmask 74752   ;;  %s67_s12 = int_to_ptr.vmem [resolvable:$true] %s66_s12  ;;  %s69_s15 = int_to_ptr.hbm [resolvable:$true] %s68_s15 }
   0x7   :  { %v17_v9 = vld [vmem:[%s171_s1 + $0x8] sm:$0xff]  ;;  %v16_v10 = vld [vmem:[%s171_s1] sm:$0xff] }
   0x8   :  { %47 = vmatpush.msra.mxu0 %v23_v3  ;;  %v15_v11 = vld [vmem:[%s170_s0] sm:$0x3] }
   0x9   :  { %v80_v12 = vld [vmem:[%s172_s2] ss:$0 sm:$0xff] }
   0xa   :  { %48 = vmatpush.msra.mxu0 %v22_v4 }
   0xc   :  { %49 = vmatpush.msra.mxu0 %v21_v5 }
   0xe   :  { %50 = vmatpush.msra.mxu0 %v20_v6 }
  0x10   :  { %51 = vmatpush.msra.mxu0 %v19_v7 }
  0x12   :  { %52 = vmatpush.msra.mxu0 %v18_v8 }
  0x14   :  { %53 = vmatpush.msra.mxu0 %v17_v9 }
  0x16   :  { %54 = vmatpush.msra.mxu0 %v16_v10 }
  0x17   :  { %78 = vmatmul.msk.f32.vlgmr.msra.gmra.mxu0 %vm31_vm1, %v15_v11 }
  0x94   :  { %v56_v13 = vpop.f32.mrf.mxu0 }
  0x95   :  { %v57_v14 = vadd.f32 %v80_v12, %v56_v13 }
  0x97   :  { %60 = vst.msk [vmem:[#allocation2] sm:$0x3] %vm59_vm2, %v57_v14 }
  0x98   :  { %71 = dma.vmem_to_hbm [thread:$0]  %s67_s12, 32, %s69_s15, [#allocation3]  }
  0x99   :  { %105 = dma.done.wait [#allocation3], 32  }
  0x9a   :  { %106 = vsyncadd [#allocation3], 4294967264 }
  0x9b   :  { %76 = vsyncpa [#allocation3], 1 }

</bundles_post_ra>
